<compile_context>
chip_gen: v6e
topology: v6e:2x2x1
jax: 0.10.0
libtpu: 0.0.40
codegen_flags: <defaults>
</compile_context>

<pallas_src>
import functools

import jax
import jax.numpy as jnp
from jax.experimental import pallas as pl
from jax.experimental.pallas import tpu as pltpu


def _ohem_ce_kernel(labels_ref, logits_ref, loss_ref, *, ignore_lb: int):
    """Per-pixel cross-entropy with ignore_index for one (C, TILE) pixel tile.

    labels_ref: (1, 1, TILE) int32   -- pixels on the lane axis
    logits_ref: (1, C, TILE) native dtype (f32 / bf16 on the wire)
    loss_ref:   (1, 1, TILE) float32
    """
    logits = logits_ref[0].astype(jnp.float32)   # (C, TILE), f32 math in-kernel
    labels = labels_ref[0]                       # (1, TILE)

    # numerically stable log-sum-exp over the class (sublane) axis
    m = jnp.max(logits, axis=0, keepdims=True)                        # (1, TILE)
    lse = jnp.log(jnp.sum(jnp.exp(logits - m), axis=0, keepdims=True))

    # gather the target logit via a one-hot compare (no dynamic gather on TPU);
    # nll = logsumexp(x) - x_target  (avoids materializing the full logp matrix)
    cls = jax.lax.broadcasted_iota(jnp.int32, logits.shape, 0)        # (C, TILE)
    onehot = (cls == labels).astype(jnp.float32)
    tgt = jnp.sum(logits * onehot, axis=0, keepdims=True)             # (1, TILE)
    nll = (lse + m) - tgt                                             # (1, TILE)

    # ignore_index -> loss 0 (matches torch CrossEntropyLoss(reduction='none'))
    valid = labels != ignore_lb
    loss_ref[0] = jnp.where(valid, nll, jnp.zeros_like(nll))


def pixelwise_ce_loss(logits_nchw, labels_nhw, ignore_lb=255, tile_hw=2048):
    """Per-pixel CE loss, shape (N, H*W) float32. Hot path in Pallas.

    Logits are read in their native NCHW layout (viewed as (N, C, H*W)) and
    native dtype; only the in-kernel math is f32.
    """
    N, C, H, W = logits_nchw.shape
    HW = H * W

    if HW <= tile_hw:
        tile = HW                                    # full spatial extent per tile
    else:
        tile = max(128, (tile_hw // 128) * 128)      # lane-aligned pixel tile
    grid_t = pl.cdiv(HW, tile)                       # partial last tile: OOB reads only
                                                     # touch padded lanes, OOB writes dropped

    logits_nc_hw = logits_nchw.reshape(N, C, HW)                 # free view of NCHW
    labels_n1_hw = labels_nhw.reshape(N, 1, HW).astype(jnp.int32)

    loss = pl.pallas_call(
        functools.partial(_ohem_ce_kernel, ignore_lb=ignore_lb),
        out_shape=jax.ShapeDtypeStruct((N, 1, HW), jnp.float32),
        grid=(N, grid_t),
        in_specs=[
            pl.BlockSpec((1, 1, tile), lambda n, t: (n, 0, t)),
            pl.BlockSpec((1, C, tile), lambda n, t: (n, 0, t)),
        ],
        out_specs=pl.BlockSpec((1, 1, tile), lambda n, t: (n, 0, t)),
        compiler_params=pltpu.CompilerParams(
            dimension_semantics=("parallel", "parallel")
        ),
    )(labels_n1_hw, logits_nc_hw)
    return loss.reshape(N, HW)


def ohem_ce_loss(logits_nchw, labels_nhw, thresh, n_min, ignore_lb=255):
    """Forward of OhemCELoss: scalar float32."""
    loss = pixelwise_ce_loss(logits_nchw, labels_nhw, ignore_lb=ignore_lb).reshape(-1)
    thresh_val = -jnp.log(jnp.asarray(thresh, dtype=jnp.float32))

    over = loss > thresh_val
    cnt = jnp.sum(over)

    # sorted_loss[n_min] > thresh  <=>  count(loss > thresh) > n_min
    def hard_branch():
        # mean of all losses strictly above thresh (cnt > n_min here)
        return jnp.sum(jnp.where(over, loss, 0.0)) / jnp.maximum(cnt, 1).astype(jnp.float32)

    def topk_branch():
        # mean of the n_min largest losses.
        # TODO(synk): descending sort / top-k has no clean Pallas TPU primitive; done in
        # plain-JAX glue, but only paid when this branch is actually taken (lax.cond).
        return jnp.mean(jax.lax.top_k(loss, n_min)[0])

    return jax.lax.cond(cnt > n_min, hard_branch, topk_branch)


def _reference_ohem(logits_nchw, labels_nhw, thresh, n_min, ignore_lb=255):
    """Pure-JAX reference mirroring the PyTorch module exactly."""
    N, C, H, W = logits_nchw.shape
    logp = jax.nn.log_softmax(
        jnp.transpose(logits_nchw, (0, 2, 3, 1)).reshape(-1, C).astype(jnp.float32), axis=-1
    )
    lab = labels_nhw.reshape(-1)
    valid = lab != ignore_lb
    safe = jnp.where(valid, lab, 0)
    nll = -jnp.take_along_axis(logp, safe[:, None], axis=-1)[:, 0]
    loss = jnp.where(valid, nll, 0.0)
    loss_sorted = jnp.sort(loss)[::-1]
    thresh_val = -jnp.log(jnp.asarray(thresh, dtype=jnp.float32))
    cond = loss_sorted[n_min] > thresh_val
    over = loss_sorted > thresh_val
    hard_mean = jnp.sum(jnp.where(over, loss_sorted, 0.0)) / jnp.maximum(
        jnp.sum(over), 1
    ).astype(jnp.float32)
    topk_mean = jnp.mean(loss_sorted[:n_min])
    return jnp.where(cond, hard_mean, topk_mean)


if __name__ == "__main__":
    # small shapes consistent with the module's forward: logits (N, C, H, W), labels (N, H, W)
    N, C, H, W = 2, 4, 16, 16
    thresh = 0.7
    n_min = (N * H * W) // 8  # 64
    ignore_lb = 255

    key = jax.random.PRNGKey(0)
    k_logits, k_labels, k_ignore = jax.random.split(key, 3)

    logits = jax.random.normal(k_logits, (N, C, H, W), dtype=jnp.float32) * 2.0
    labels = jax.random.randint(k_labels, (N, H, W), 0, C, dtype=jnp.int32)
    # sprinkle some ignored pixels
    labels = jnp.where(jax.random.uniform(k_ignore, (N, H, W)) < 0.1, ignore_lb, labels)

    out = ohem_ce_loss(logits, labels, thresh, n_min, ignore_lb=ignore_lb)
    out = jax.block_until_ready(out)

    ref = jax.block_until_ready(_reference_ohem(logits, labels, thresh, n_min, ignore_lb))
    assert jnp.allclose(out, ref, rtol=1e-5, atol=1e-5), (out, ref)

    print("KERNEL_OK")
</pallas_src>

<mosaic_0001>
module attributes {stable_mosaic.version = 11 : i64} {
  func.func @_ohem_ce_kernel(%arg0: i32, %arg1: i32, %arg2: memref<1x1x256xi32, #tpu.memory_space<vmem>>, %arg3: memref<1x4x256xf32, #tpu.memory_space<vmem>>, %arg4: memref<1x1x256xf32, #tpu.memory_space<vmem>>) attributes {dimension_semantics = [#tpu.dimension_semantics<parallel>, #tpu.dimension_semantics<parallel>], iteration_bounds = array<i64: 2, 1>, scalar_prefetch = 0 : i64, scratch_operands = 0 : i64, tpu.core_type = #tpu.core_type<tc>, window_params = [{transform_indices = @transform_0, window_bounds = array<i64: 1, 1, 256>}, {transform_indices = @transform_1, window_bounds = array<i64: 1, 4, 256>}, {transform_indices = @transform_2, window_bounds = array<i64: 1, 1, 256>}]} {
    %c0 = arith.constant 0 : index
    %c0_0 = arith.constant 0 : index
    %c0_1 = arith.constant 0 : index
    %0 = vector.load %arg3[%c0, %c0_0, %c0_1] : memref<1x4x256xf32, #tpu.memory_space<vmem>>, vector<1x4x256xf32>
    %1 = vector.shape_cast %0 : vector<1x4x256xf32> to vector<4x256xf32>
    %c0_2 = arith.constant 0 : index
    %c0_3 = arith.constant 0 : index
    %c0_4 = arith.constant 0 : index
    %2 = vector.load %arg2[%c0_2, %c0_3, %c0_4] : memref<1x1x256xi32, #tpu.memory_space<vmem>>, vector<1x1x256xi32>
    %3 = vector.shape_cast %2 : vector<1x1x256xi32> to vector<1x256xi32>
    %cst = arith.constant dense<0xFF800000> : vector<256xf32>
    %4 = vector.multi_reduction <maximumf>, %1, %cst [0] : vector<4x256xf32> to vector<256xf32>
    %5 = vector.shape_cast %4 : vector<256xf32> to vector<1x256xf32>
    %6 = vector.broadcast %5 : vector<1x256xf32> to vector<4x256xf32>
    %7 = arith.subf %1, %6 : vector<4x256xf32>
    %8 = math.exp %7 : vector<4x256xf32>
    %cst_5 = arith.constant dense<0.000000e+00> : vector<256xf32>
    %9 = vector.multi_reduction <add>, %8, %cst_5 [0] : vector<4x256xf32> to vector<256xf32>
    %10 = vector.shape_cast %9 : vector<256xf32> to vector<1x256xf32>
    %11 = math.log %10 : vector<1x256xf32>
    %12 = tpu.iota {dimensions = array<i32: 0>} : vector<4x256xi32>
    %13 = vector.broadcast %3 : vector<1x256xi32> to vector<4x256xi32>
    %14 = arith.cmpi eq, %12, %13 : vector<4x256xi32>
    %15 = arith.extui %14 : vector<4x256xi1> to vector<4x256xi32>
    %16 = arith.sitofp %15 : vector<4x256xi32> to vector<4x256xf32>
    %17 = arith.mulf %1, %16 : vector<4x256xf32>
    %cst_6 = arith.constant dense<0.000000e+00> : vector<256xf32>
    %18 = vector.multi_reduction <add>, %17, %cst_6 [0] : vector<4x256xf32> to vector<256xf32>
    %19 = vector.shape_cast %18 : vector<256xf32> to vector<1x256xf32>
    %20 = arith.addf %11, %5 : vector<1x256xf32>
    %21 = arith.subf %20, %19 : vector<1x256xf32>
    %c255_i32 = arith.constant 255 : i32
    %22 = vector.broadcast %c255_i32 : i32 to vector<1x256xi32>
    %23 = arith.cmpi ne, %3, %22 : vector<1x256xi32>
    %cst_7 = arith.constant 0.000000e+00 : f32
    %24 = vector.broadcast %cst_7 : f32 to vector<1x256xf32>
    %25 = arith.select %23, %21, %24 : vector<1x256xi1>, vector<1x256xf32>
    %c0_8 = arith.constant 0 : index
    %c0_9 = arith.constant 0 : index
    %c0_10 = arith.constant 0 : index
    %26 = vector.load %arg4[%c0_8, %c0_9, %c0_10] : memref<1x1x256xf32, #tpu.memory_space<vmem>>, vector<1x1x256xf32>
    %27 = vector.shape_cast %26 : vector<1x1x256xf32> to vector<1x256xf32>
    %28 = vector.shape_cast %25 : vector<1x256xf32> to vector<1x1x256xf32>
    tpu.vector_store %arg4[%c0_8, %c0_9, %c0_10], %28 {strides = array<i32>} : memref<1x1x256xf32, #tpu.memory_space<vmem>>, vector<1x1x256xf32>,
    return
  }
  func.func @transform_0(%arg0: i32, %arg1: i32) -> (i32, i32, i32) {
    %c0_i32 = arith.constant 0 : i32
    %c0_i32_0 = arith.constant 0 : i32
    return %arg0, %c0_i32, %arg1 : i32, i32, i32
  }
  func.func @transform_1(%arg0: i32, %arg1: i32) -> (i32, i32, i32) {
    %c0_i32 = arith.constant 0 : i32
    %c0_i32_0 = arith.constant 0 : i32
    return %arg0, %c0_i32, %arg1 : i32, i32, i32
  }
  func.func @transform_2(%arg0: i32, %arg1: i32) -> (i32, i32, i32) {
    %c0_i32 = arith.constant 0 : i32
    %c0_i32_0 = arith.constant 0 : i32
    return %arg0, %c0_i32, %arg1 : i32, i32, i32
  }
}

</mosaic_0001>

<bundles_post_ra>
// kernel: tpu_custom_call.1
= control target key start
LH: loop header
LB: loop body
LE: loop exit
PB: predicated region body
PF: predicated region fallthrough
CT: control target
= control target key end

     0   :  { %7 = vsyncpa [#allocation3], 0  ;;  %s914_s0 = inlined_call_operand.hbm [shape: s32[2,1,256], index: 0, kind: input, shape index: {}]   ;;  %s915_s1 = inlined_call_operand.hbm [shape: f32[2,4,256], index: 1, kind: input, shape index: {}]   ;;  %s916_s2 = inlined_call_operand.hbm [shape: f32[2,1,256], index: 2, kind: output, shape index: {}]  }
   0x1   :  { %9 = vsyncpa [#allocation3 + $0x1], 0 }
   0x2   :  { %10 = vsyncpa [#allocation6], 0 }
   0x3   :  { %12 = vsyncpa [#allocation6 + $0x1], 0 }
   0x4   :  { %13 = vsyncpa [#allocation4], 0 }
   0x5   :  { %15 = vsyncpa [#allocation4 + $0x1], 0  ;;  %s727_s9 = smov 0   ;;  %s729_s10 = smov 0  }
   0x6   :  { %s731_s11 = smov 0   ;;  %s733_s12 = smov 0  }
   0x7   :  { %s735_s13 = smov 0   ;;  %s737_s14 = smov 0  }
   0x8 LB: > { %s465_s15 = sadd.s32 4294967295, %s705_s14   ;;  %s466_s16 = sadd.s32 4294967294, %s705_s14   ;;  %s705_s14 = sphi %s737_s14, %s21_s14   ;;  %s701_s13 = sphi %s735_s13, %s928_s13   ;;  %s697_s12 = sphi %s733_s12, %s927_s12   ;;  %s693_s11 = sphi %s731_s11, %s926_s11   ;;  %s689_s10 = sphi %s729_s10, %s925_s10   ;;  %s685_s9 = sphi %s727_s9, %s924_s9  }
   0x9   : > { %s33_s17 = sadd.s32 1, %s701_s13  ;;  %s42_s18 = sadd.s32 1, %s693_s11 }
   0xa   : > { %p35_p0 = scmp.ge.s32.totalorder %s33_s17, 2  ;;  %p49_p1 = scmp.ne.s32.totalorder %s693_s11, %s689_s10 }
   0xb   : > { %p50_p2 = scmp.eq.s32.totalorder %s705_s14, 0  ;;  %p55_p3 = scmp.ne.s32.totalorder %s689_s10, %s685_s9 }
   0xc   : > { %s930_s17 = smov (%p35_p0, %s33_s17), 0  ;;  %p56_p5 = scmp.eq.s32.totalorder %s465_s15, 0 }
   0xd   : > { %p768_p4 = por %p50_p2, %p49_p1  ;;  %s37_s20 = ssub.s32 %s701_s13, %s930_s17 }
   0xe   : > { %p109_p6 = scmp.eq.s32.totalorder %s465_s15, 1  ;;  %p40_p7 = scmp.eq.s32.totalorder %s37_s20, 0 }
   0xf   : > { %p774_p8 = por %p56_p5, %p55_p3  ;;  %p115_p10 = scmp.eq.s32.totalorder %s466_s16, 1 }
  0x10   : > { %p778_p9 = por %p109_p6, %p49_p1  ;;  %p506_p13 = scmp.lt.s32.totalorder %s705_s14, 2 }
  0x11   : > { %s783_s23 = scalar_select %p40_p7, %s693_s11, %s42_s18  }
  0x12   : > { %p785_p11 = por %p115_p10, %p55_p3  ;;  %s792_s25 = sand.u32 1, %s693_s11  }
  0x13   : > { %s469_s26 = sshll.u32 %s792_s25, 1  ;;  %s486_s27 = sshll.u32 %s701_s13, 5 }
  0x14   : > { %s147_s30 = scalar_lea.hbm %s914_s0, %s486_s27  ;;  %s139_s3 = scalar_lea.vmem [#allocation2], %s469_s26 }
  0x15   : > { %s149_s4 = sshll.u32 %s139_s3, 4  ;;  %p801_p0 = pnand %p506_p13, %p768_p4  ;;  %s150_s4 = int_to_ptr.vmem [resolvable:$true] %s149_s4 }
  0x16   : > { %p475_p1 = scmp.ge.s32.totalorder %s705_s14, 1  ;;  %p175_p2 = scmp.lt.s32.totalorder %s705_s14, 3 }
  0x17   : > { %s136_s6 = scalar_lea.sflag [#allocation3], %s792_s25  ;;  %p567_p3 = pneg %p801_p0 }
  0x18   : > { %s578_s7 = scalar_lea.vmem %s150_s4, 32  ;;  %s707_s8 = smov [#allocation2]  }
  0x19   : > { %p579_p5 = scmp.ne.s32.totalorder %s150_s4, %s578_s7  ;;  %s583_s15 = sshll.u32 %s707_s8, 4  ;;  %s584_s15 = int_to_ptr.vmem [resolvable:$false] %s583_s15 }
  0x1a   : > { %s585_s16 = scalar_lea.vmem %s584_s15, 64  ;;  %p586_p4 = scmp.lt.s32.totalorder %s150_s4, %s584_s15 }
  0x1b   : > { %p581_p6 = pnand %p579_p5, %p567_p3  ;;  %p587_p10 = scmp.lt.s32.totalorder %s585_s16, %s578_s7 }
  0x1d   : > { %p582_p7 = pneg %p581_p6  ;;  %p588_p13 = por %p587_p10, %p586_p4 }
  0x1f   : > { %p589_p12 = pnand %p588_p13, %p582_p7 }
  0x21   : > { %592 = shalt.err (!%p589_p12)
}
  0x22   : > { %498 = dma.hbm_to_vmem [thread:$0]  (!%p801_p0), %s147_s30, 32, %s150_s4, %s136_s6  }
  0x23   : > { %p819_p5 = pnand %p475_p1, %p175_p2  ;;  %s472_s19 = sshll.u32 %s792_s25, 3 }
  0x24   : > { %s487_s20 = sshll.u32 %s701_s13, 7  ;;  %s160_s29 = scalar_lea.vmem [#allocation5], %s472_s19 }
  0x25   : > { %s168_s28 = scalar_lea.hbm %s915_s1, %s487_s20  ;;  %s170_s3 = sshll.u32 %s160_s29, 4  ;;  %s171_s3 = int_to_ptr.vmem [resolvable:$true] %s170_s3 }
  0x26   : > { %s157_s7 = scalar_lea.sflag [#allocation6], %s792_s25  ;;  %s606_s8 = scalar_lea.vmem %s171_s3, 128 }
  0x27   : > { %p607_p12 = scmp.ne.s32.totalorder %s171_s3, %s606_s8  ;;  %s708_s30 = smov [#allocation5]  }
  0x28   : > { %s611_s4 = sshll.u32 %s708_s30, 4  ;;  %s612_s4 = int_to_ptr.vmem [resolvable:$false] %s611_s4 }
  0x29   : > { %p609_p6 = pnand %p607_p12, %p567_p3  ;;  %s613_s6 = scalar_lea.vmem %s612_s4, 256 }
  0x2a   : > { %p614_p1 = scmp.lt.s32.totalorder %s171_s3, %s612_s4  ;;  %p615_p2 = scmp.lt.s32.totalorder %s613_s6, %s606_s8 }
  0x2b   : > { %p610_p7 = pneg %p609_p6 }
  0x2c   : > { %p616_p4 = por %p615_p2, %p614_p1 }
  0x2e   : > { %p617_p10 = pnand %p616_p4, %p610_p7 }
  0x30   : > { %620 = shalt.err (!%p617_p10)
}
  0x31   : > { %501 = dma.hbm_to_vmem [thread:$0]  (!%p801_p0), %s168_s28, 128, %s171_s3, %s157_s7  }
  0x32   : > { %179 = sbr.rel (%p819_p5) target bundleno = 150 (0x96), region = 28  ;;  %s837_s25 = sand.u32 (!%p819_p5), 1, %s689_s10  }
  0x33   : > { %s476_s15 = sshll.u32 (!%p819_p5), %s837_s25, 1  ;;  %s182_s16 = scalar_lea.sflag (!%p819_p5), [#allocation3], %s837_s25 }
  0x34   : > { %s185_s19 = scalar_lea.vmem (!%p819_p5), [#allocation2], %s476_s15 }
  0x37   : > { %672 = dma.done.wait (%p774_p8), %s182_s16, 32  }
  0x38   : > { %674 = vsyncadd (%p774_p8), %s182_s16, 4294967264  ;;  %s477_s5 = sshll.u32 %s837_s25, 3  ;;  %s191_s18 = scalar_lea.sflag [#allocation6], %s837_s25 }
  0x39   : > { %s194_s20 = scalar_lea.vmem [#allocation5], %s477_s5 }
  0x3a   : > { %676 = dma.done.wait (%p774_p8), %s191_s18, 128  }
  0x3b   : > { %678 = vsyncadd (%p774_p8), %s191_s18, 4294967168  ;;  %vm228_vm0 = vcmask 1043456   ;;  %v223_v0 = vld [vmem:[%s194_s20] sm:$0xff]  ;;  %v271_v11 = vlaneseq  ;;  %v856_v21 = vld [vmem:[%s185_s19] sm:$0x3]  ;;  %v709_v26 = vmov 0.0  }
  0x3c   : > { %v226_v1 = vcombine.high %v223_v0, %v223_v0  ;;  %v229_v2 = vsel %vm228_vm0, %v223_v0, -inf  ;;  %v710_v60 = vmov 1966171168   ;;  %s219_s21 = scalar_lea.vmem [#allocation7], %s476_s15  ;;  %s488_s27 = sshll.u32 %s697_s12, 5  ;;  %vm313_vm3 = vcmp.ne.s32.totalorder %v856_v21, 255 }
  0x3d   : > { %v230_v3 = vrot.slane %v229_v2, 4  ;;  %v272_v16 = vshrl.u32 %v271_v11, 7  ;;  %v318_v61 = vunpack.c.l.s4 %v710_v60  ;;  %s355_s26 = sshll.u32 %s219_s21, 4  ;;  %vm335_vm4 = vcmp.lt.s32.totalorder %v271_v11, 256  ;;  %s353_s3 = scalar_lea.hbm %s916_s2, %s488_s27  ;;  %s869_s26 = int_to_ptr.vmem [resolvable:$true] %s355_s26 }
  0x3e   : > { %v236_v4 = vsel %vm228_vm0, %v226_v1, -inf  ;;  %s339_s7 = scalar_lea.sflag [#allocation4], %s837_s25  ;;  %s621_s8 = scalar_lea.vmem %s869_s26, 32 }
  0x3f   : > { %v231_v5 = vmax.f32 %v229_v2, %v230_v3  ;;  %v237_v6 = vrot.slane %v236_v4, 4  ;;  %v275_v19 = vsub.s32 0, %v272_v16  ;;  %v279_v20 = vsub.s32 1, %v272_v16  ;;  %p622_p8 = scmp.ne.s32.totalorder %s869_s26, %s621_s8  ;;  %s711_s12 = smov [#allocation7]  }
  0x40   : > { %s625_s30 = sshll.u32 %s711_s12, 4  ;;  %s626_s30 = int_to_ptr.vmem [resolvable:$false] %s625_s30 }
  0x41   : > { %v232_v7 = vrot.slane %v231_v5, 2  ;;  %v238_v8 = vmax.f32 %v236_v4, %v237_v6  ;;  %v276_v24 = vrot.slane %v856_v21, %v275_v19  ;;  %v280_v25 = vrot.slane %v856_v21, %v279_v20  ;;  %p623_p0 = pnand %p622_p8, %p778_p9  ;;  %s627_s4 = scalar_lea.vmem %s626_s30, 64 }
  0x42   : > { %p628_p13 = scmp.lt.s32.totalorder %s869_s26, %s626_s30  ;;  %p629_p5 = scmp.lt.s32.totalorder %s627_s4, %s621_s8 }
  0x43   : > { %v233_v9 = vmax.f32 %v231_v5, %v232_v7  ;;  %v239_v10 = vrot.slane %v238_v8, 2  ;;  %vm281_vm1 = vcmp.eq.s32.totalorder %v272_v16, %v276_v24  ;;  %vm282_vm2 = vcmp.eq.s32.totalorder %v272_v16, %v280_v25  ;;  %p624_p3 = pneg %p623_p0 }
  0x44   : > { %v479_v27 = vsel %vm281_vm1, 1.0, %v709_v26  ;;  %v480_v28 = vsel %vm282_vm2, 1.0, %v709_v26  ;;  %v319_v5 = vunpack.c.0.s8 %v318_v61  ;;  %p630_p12 = por %p629_p5, %p628_p13 }
  0x45   : > { %v234_v12 = vrot.slane %v233_v9, 1  ;;  %v240_v13 = vmax.f32 %v238_v8, %v239_v10  ;;  %v289_v29 = vcombine.low %v479_v27, %v480_v28 }
  0x46   : > { %p631_p6 = pnand %p630_p12, %p624_p3 }
  0x47   : > { %v235_v14 = vmax.f32 %v233_v9, %v234_v12  ;;  %v241_v15 = vrot.slane %v240_v13, 1  ;;  %v291_v30 = vmul.f32 %v289_v29, %v223_v0  ;;  %v322_v9 = vsub.s32 %v319_v5, %v272_v16 }
  0x49   : > { %v242_v17 = vmax.f32 %v240_v13, %v241_v15  ;;  %v293_v36 = vcombine.high %v291_v30, %v291_v30  ;;  %v295_v39 = vsel %vm228_vm0, %v291_v30, 0.0 }
  0x4a   : > { %v296_v45 = vrot.slane %v295_v39, 4 }
  0x4b   : > { %v245_v18 = vcombine.low %v235_v14, %v242_v17  ;;  %v302_v42 = vsel %vm228_vm0, %v293_v36, 0.0 }
  0x4c   : > { %v303_v48 = vrot.slane %v302_v42, 4  ;;  %v297_v51 = vadd.f32 %v296_v45, %v295_v39 }
  0x4d   : > { %v247_v22 = vsub.f32 %v223_v0, %v245_v18 }
  0x4e   : > { %v304_v53 = vadd.f32 %v303_v48, %v302_v42  ;;  %v298_v54 = vrot.slane %v297_v51, 2 }
  0x4f   : > { %v248_v23 = vmul.f32 1.442695, %v247_v22 }
  0x50   : > { %v305_v55 = vrot.slane %v304_v53, 2  ;;  %v299_v56 = vadd.f32 %v298_v54, %v297_v51 }
  0x51   : > { %559 = vpow2.f32 %v248_v23 }
  0x52   : > { %v306_v57 = vadd.f32 %v305_v55, %v304_v53  ;;  %v300_v58 = vrot.slane %v299_v56, 1 }
  0x54   : > { %v307_v59 = vrot.slane %v306_v57, 1  ;;  %v301_v0 = vadd.f32 %v300_v58, %v299_v56 }
  0x56   : > { %v308_v3 = vadd.f32 %v307_v59, %v306_v57 }
  0x5e   : > { %v560_v31 = vpop.eup %559 }
  0x5f   : > { %v251_v32 = vcombine.high %v560_v31, %v560_v31  ;;  %v253_v33 = vsel %vm228_vm0, %v560_v31, 0.0 }
  0x60   : > { %v254_v34 = vrot.slane %v253_v33, 4 }
  0x61   : > { %v260_v35 = vsel %vm228_vm0, %v251_v32, 0.0 }
  0x62   : > { %v255_v37 = vadd.f32 %v254_v34, %v253_v33  ;;  %v261_v38 = vrot.slane %v260_v35, 4 }
  0x64   : > { %v256_v40 = vrot.slane %v255_v37, 2  ;;  %v262_v41 = vadd.f32 %v261_v38, %v260_v35 }
  0x66   : > { %v257_v43 = vadd.f32 %v256_v40, %v255_v37  ;;  %v263_v44 = vrot.slane %v262_v41, 2 }
  0x68   : > { %v258_v46 = vrot.slane %v257_v43, 1  ;;  %v264_v47 = vadd.f32 %v263_v44, %v262_v41 }
  0x6a   : > { %v259_v49 = vadd.f32 %v258_v46, %v257_v43  ;;  %v265_v50 = vrot.slane %v264_v47, 1 }
  0x6c   : > { %v266_v52 = vadd.f32 %v265_v50, %v264_v47  ;;  %561 = vlog2.f32 %v259_v49 }
  0x6e   : > { %563 = vlog2.f32 %v266_v52 }
  0x79   : > { %v562_v62 = vpop.eup %561 }
  0x7a   : > { %v268_v63 = vmul.f32 0.6931472, %v562_v62 }
  0x7b   : > { %v564_v1 = vpop.eup %563 }
  0x7c   : > { %v270_v2 = vmul.f32 0.6931472, %v564_v1  ;;  %v309_v4 = vadd.f32 %v268_v63, %v235_v14 }
  0x7e   : > { %v310_v6 = vadd.f32 %v270_v2, %v242_v17  ;;  %v311_v7 = vsub.f32 %v309_v4, %v301_v0 }
  0x80   : > { %v312_v8 = vsub.f32 %v310_v6, %v308_v3 }
  0x82   : > { %v316_v10 = vcombine.low %v311_v7, %v312_v8 }
  0x84   : > { %v323_v12 = vrot.slane %v316_v10, %v322_v9 }
  0x86   : > { %v330_v13 = vrot.slane %v323_v12, %v322_v9 }
  0x88   : > { %v332_v14 = vsel %vm313_vm3, %v330_v13, 0.0 }
  0x89   : > { %337 = vst.msk [vmem:[%s219_s21] sm:$0x3] %vm335_vm4, %v332_v14 }
  0x8a   : > { %634 = shalt.err (!%p631_p6)
}
  0x8b   : > { %s635_s6 = scalar_lea.hbm %s353_s3, 32  ;;  %s639_s16 = scalar_lea.hbm %s916_s2, 64 }
  0x8c   : > { %p636_p7 = scmp.ne.s32.totalorder %s353_s3, %s635_s6  ;;  %p640_p4 = scmp.lt.s32.totalorder %s353_s3, %s916_s2 }
  0x8d   : > { %p641_p10 = scmp.lt.s32.totalorder %s639_s16, %s635_s6 }
  0x8e   : > { %p637_p1 = pnand %p636_p7, %p778_p9 }
  0x8f   : > { %p642_p8 = por %p641_p10, %p640_p4 }
  0x90   : > { %p638_p2 = pneg %p637_p1 }
  0x92   : > { %p643_p0 = pnand %p642_p8, %p638_p2 }
  0x94   : > { %646 = shalt.err (!%p643_p0)
}
  0x95   : > { %493 = dma.vmem_to_hbm [thread:$0]  (%p778_p9), %s869_s26, 32, %s353_s3, %s339_s7  }
  0x96 PF: > { %s367_s18 = sand.u32 1, %s685_s9   ;;  %p923_p3 = scmp.ge.s32.totalorder %s705_s14, 2 }
  0x97   : > { %s368_s20 = scalar_lea.sflag [#allocation4], %s367_s18 }
  0x98   : > { %p503_p13 = pnand %p923_p3, %p785_p11 }
  0x9a   : > { %p504_p5 = pneg %p503_p13 }
  0x9c   : > { %680 = dma.done.wait (%p504_p5), %s368_s20, 32  }
  0x9d   : > { %682 = vsyncadd (%p504_p5), %s368_s20, 4294967264  ;;  %s21_s14 = sadd.s32 1, %s705_s14   ;;  %s924_s9 = smov %s689_s10 }
  0x9e   : > { %p18_p12 = scmp.ge.s32.totalorder %s21_s14, 4   ;;  %s925_s10 = smov %s693_s11 }
  0x9f   : > { %s926_s11 = smov %s783_s23  ;;  %s927_s12 = smov %s701_s13 }
  0xa0   : > { %s928_s13 = smov %s930_s17  ;;  %20 = sbr.rel (!%p18_p12) target bundleno = 8 (0x8), region = 86 }
  0xa5   :  { %373 = vsyncpa [#allocation3], 1 }
  0xa6   :  { %375 = vsyncpa [#allocation3 + $0x1], 1 }
  0xa7   :  { %376 = vsyncpa [#allocation6], 1 }
  0xa8   :  { %378 = vsyncpa [#allocation6 + $0x1], 1 }
  0xa9   :  { %379 = vsyncpa [#allocation4], 1 }
  0xaa   :  { %381 = vsyncpa [#allocation4 + $0x1], 1 }

</bundles_post_ra>
